<compile_context>
chip_gen: v7x
topology: tpu7x:2x2x1
jax: 0.10.0
libtpu: 0.0.40
codegen_flags: <defaults>
</compile_context>

<pallas_src>
import jax
import jax.numpy as jnp
from jax.experimental import pallas as pl
from jax.experimental.pallas import tpu as pltpu

_LANE = 128  # lane width; also the M-tile (multiple of 8 sublanes, fills v5e MXU)


def qnet_kernel(x_ref, w1_ref, b1_ref, w2_ref, b2_ref, w3_ref, b3_ref, o_ref):
    # One (TM, S_pad) batch tile per grid step; weights are VMEM-resident.
    bf16 = jnp.bfloat16
    x = x_ref[...]                                                     # bf16 (TM, 128)
    h1 = jnp.dot(x, w1_ref[...], preferred_element_type=jnp.float32)   # MXU, f32 acc
    h1 = jnp.maximum(h1 + b1_ref[...], 0.0)                            # f32 bias + relu
    h2 = jnp.dot(h1.astype(bf16), w2_ref[...],
                 preferred_element_type=jnp.float32)
    h2 = jnp.maximum(h2 + b2_ref[...], 0.0)
    out = jnp.dot(h2.astype(bf16), w3_ref[...],
                  preferred_element_type=jnp.float32) + b3_ref[...]
    o_ref[...] = out.astype(o_ref.dtype)                               # lane-dense store


def _round_up(n, m):
    return ((n + m - 1) // m) * m


def qnetwork_forward(x, params, *, tm=_LANE):
    """Fused QNetwork forward. Accepts any batch / state / action size; pads to
    lane-dense shapes internally and slices the result back."""
    w1, b1, w2, b2, w3, b3 = params
    B, state_size = x.shape
    action_size = w3.shape[1]

    s_pad = _round_up(state_size, _LANE)
    a_pad = _round_up(action_size, _LANE)
    b_pad = _round_up(B, tm)

    bf16, f32 = jnp.bfloat16, jnp.float32

    # Zero-pad (padded rows/cols contribute exactly zero) and cast MXU operands to bf16.
    x_p = jnp.pad(x, ((0, b_pad - B), (0, s_pad - state_size))).astype(bf16)
    w1_p = jnp.pad(w1, ((0, s_pad - state_size), (0, 0))).astype(bf16)
    w2_p = w2.astype(bf16)
    w3_p = jnp.pad(w3, ((0, 0), (0, a_pad - action_size))).astype(bf16)
    b1_p = b1.astype(f32)
    b2_p = b2.astype(f32)
    b3_p = jnp.pad(b3, ((0, 0), (0, a_pad - action_size))).astype(f32)

    # Whole-array, grid-invariant blocks: weights stay resident in VMEM.
    const = lambda a: pl.BlockSpec(a.shape, lambda i: (0,) * a.ndim)

    out_p = pl.pallas_call(
        qnet_kernel,
        out_shape=jax.ShapeDtypeStruct((b_pad, a_pad), f32),
        grid=(b_pad // tm,),
        in_specs=[
            pl.BlockSpec((tm, s_pad), lambda i: (i, 0)),   # x: tiled over batch
            const(w1_p), const(b1_p),
            const(w2_p), const(b2_p),
            const(w3_p), const(b3_p),
        ],
        out_specs=pl.BlockSpec((tm, a_pad), lambda i: (i, 0)),
        compiler_params=pltpu.CompilerParams(
            dimension_semantics=("parallel",),             # shards batch across v7x TCs
        ),
    )(x_p, w1_p, b1_p, w2_p, b2_p, w3_p, b3_p)

    return out_p[:B, :action_size]


def init_params(key, state_size, action_size):
    """PyTorch nn.Linear-style init: U(-1/sqrt(fan_in), 1/sqrt(fan_in)), deterministic."""
    def linear(k, fan_in, fan_out):
        kw, kb = jax.random.split(k)
        bound = 1.0 / jnp.sqrt(float(fan_in))
        w = jax.random.uniform(kw, (fan_in, fan_out), jnp.float32, -bound, bound)
        b = jax.random.uniform(kb, (1, fan_out), jnp.float32, -bound, bound)
        return w, b

    k1, k2, k3 = jax.random.split(key, 3)
    w1, b1 = linear(k1, state_size, 256)
    w2, b2 = linear(k2, 256, 128)
    w3, b3 = linear(k3, 128, action_size)
    return (w1, b1, w2, b2, w3, b3)


if __name__ == "__main__":
    key = jax.random.PRNGKey(0)
    kx, kp = jax.random.split(key)

    batch = 200          # deliberately not a multiple of the 128 tile -> exercises padding
    state_size = 16
    action_size = 4

    x = jax.random.normal(kx, (batch, state_size), jnp.float32)
    params = init_params(kp, state_size, action_size)

    fwd = jax.jit(qnetwork_forward)
    out = jax.block_until_ready(fwd(x, params))

    # Reference 1: identical bf16-input / f32-accumulate math in plain JAX (tight check).
    w1, b1, w2, b2, w3, b3 = params
    bf, f32 = jnp.bfloat16, jnp.float32
    h = jnp.maximum(jnp.dot(x.astype(bf), w1.astype(bf), preferred_element_type=f32) + b1, 0.0)
    h = jnp.maximum(jnp.dot(h.astype(bf), w2.astype(bf), preferred_element_type=f32) + b2, 0.0)
    ref_bf16 = jnp.dot(h.astype(bf), w3.astype(bf), preferred_element_type=f32) + b3

    # Reference 2: full-f32 forward (loose check, bounds bf16 quantization error).
    ref_f32 = jnp.maximum(x @ w1 + b1, 0.0)
    ref_f32 = jnp.maximum(ref_f32 @ w2 + b2, 0.0)
    ref_f32 = ref_f32 @ w3 + b3

    assert out.shape == (batch, action_size)
    assert jnp.allclose(out, ref_bf16, atol=1e-4, rtol=1e-4)
    assert jnp.allclose(out, ref_f32, atol=3e-2, rtol=3e-2)

    print("KERNEL_OK")
</pallas_src>

<mosaic_0001>
module attributes {stable_mosaic.version = 11 : i64} {
  func.func @qnet_kernel(%arg0: i32, %arg1: memref<128x128xbf16, #tpu.memory_space<vmem>>, %arg2: memref<128x256xbf16, #tpu.memory_space<vmem>>, %arg3: memref<1x256xf32, #tpu.memory_space<vmem>>, %arg4: memref<256x128xbf16, #tpu.memory_space<vmem>>, %arg5: memref<1x128xf32, #tpu.memory_space<vmem>>, %arg6: memref<128x128xbf16, #tpu.memory_space<vmem>>, %arg7: memref<1x128xf32, #tpu.memory_space<vmem>>, %arg8: memref<128x128xf32, #tpu.memory_space<vmem>>) attributes {dimension_semantics = [#tpu.dimension_semantics<parallel>], iteration_bounds = array<i64: 2>, scalar_prefetch = 0 : i64, scratch_operands = 0 : i64, tpu.core_type = #tpu.core_type<tc>, window_params = [{transform_indices = @transform_0, window_bounds = array<i64: 128, 128>}, {pipeline_mode = #tpu.pipeline_mode<synchronous>, transform_indices = @transform_1, window_bounds = array<i64: 128, 256>}, {pipeline_mode = #tpu.pipeline_mode<synchronous>, transform_indices = @transform_2, window_bounds = array<i64: 1, 256>}, {pipeline_mode = #tpu.pipeline_mode<synchronous>, transform_indices = @transform_3, window_bounds = array<i64: 256, 128>}, {pipeline_mode = #tpu.pipeline_mode<synchronous>, transform_indices = @transform_4, window_bounds = array<i64: 1, 128>}, {pipeline_mode = #tpu.pipeline_mode<synchronous>, transform_indices = @transform_5, window_bounds = array<i64: 128, 128>}, {pipeline_mode = #tpu.pipeline_mode<synchronous>, transform_indices = @transform_6, window_bounds = array<i64: 1, 128>}, {transform_indices = @transform_7, window_bounds = array<i64: 128, 128>}]} {
    %c0 = arith.constant 0 : index
    %c0_0 = arith.constant 0 : index
    %0 = vector.load %arg1[%c0, %c0_0] : memref<128x128xbf16, #tpu.memory_space<vmem>>, vector<128x128xbf16>
    %c0_1 = arith.constant 0 : index
    %c0_2 = arith.constant 0 : index
    %1 = vector.load %arg2[%c0_1, %c0_2] : memref<128x256xbf16, #tpu.memory_space<vmem>>, vector<128x256xbf16>
    %cst = arith.constant dense<0.000000e+00> : vector<128x256xf32>
    %2 = tpu.matmul %0, %1, %cst {dimension_numbers = #tpu.dot_dimension_numbers<[1], [0], [0], [1], [0, 0, 1, 1], [], []>} : vector<128x128xbf16>, vector<128x256xbf16>, vector<128x256xf32> -> vector<128x256xf32>
    %c0_3 = arith.constant 0 : index
    %c0_4 = arith.constant 0 : index
    %3 = vector.load %arg3[%c0_3, %c0_4] : memref<1x256xf32, #tpu.memory_space<vmem>>, vector<1x256xf32>
    %4 = vector.broadcast %3 : vector<1x256xf32> to vector<128x256xf32>
    %5 = arith.addf %2, %4 : vector<128x256xf32>
    %cst_5 = arith.constant 0.000000e+00 : f32
    %6 = vector.broadcast %cst_5 : f32 to vector<128x256xf32>
    %7 = arith.maximumf %5, %6 : vector<128x256xf32>
    %8 = arith.truncf %7 : vector<128x256xf32> to vector<128x256xbf16>
    %c0_6 = arith.constant 0 : index
    %c0_7 = arith.constant 0 : index
    %9 = vector.load %arg4[%c0_6, %c0_7] : memref<256x128xbf16, #tpu.memory_space<vmem>>, vector<256x128xbf16>
    %cst_8 = arith.constant dense<0.000000e+00> : vector<128x128xf32>
    %10 = tpu.matmul %8, %9, %cst_8 {dimension_numbers = #tpu.dot_dimension_numbers<[1], [0], [0], [1], [0, 0, 1, 1], [], []>} : vector<128x256xbf16>, vector<256x128xbf16>, vector<128x128xf32> -> vector<128x128xf32>
    %c0_9 = arith.constant 0 : index
    %c0_10 = arith.constant 0 : index
    %11 = vector.load %arg5[%c0_9, %c0_10] : memref<1x128xf32, #tpu.memory_space<vmem>>, vector<1x128xf32>
    %12 = vector.broadcast %11 : vector<1x128xf32> to vector<128x128xf32>
    %13 = arith.addf %10, %12 : vector<128x128xf32>
    %cst_11 = arith.constant 0.000000e+00 : f32
    %14 = vector.broadcast %cst_11 : f32 to vector<128x128xf32>
    %15 = arith.maximumf %13, %14 : vector<128x128xf32>
    %16 = arith.truncf %15 : vector<128x128xf32> to vector<128x128xbf16>
    %c0_12 = arith.constant 0 : index
    %c0_13 = arith.constant 0 : index
    %17 = vector.load %arg6[%c0_12, %c0_13] : memref<128x128xbf16, #tpu.memory_space<vmem>>, vector<128x128xbf16>
    %cst_14 = arith.constant dense<0.000000e+00> : vector<128x128xf32>
    %18 = tpu.matmul %16, %17, %cst_14 {dimension_numbers = #tpu.dot_dimension_numbers<[1], [0], [0], [1], [0, 0, 1, 1], [], []>} : vector<128x128xbf16>, vector<128x128xbf16>, vector<128x128xf32> -> vector<128x128xf32>
    %c0_15 = arith.constant 0 : index
    %c0_16 = arith.constant 0 : index
    %19 = vector.load %arg7[%c0_15, %c0_16] : memref<1x128xf32, #tpu.memory_space<vmem>>, vector<1x128xf32>
    %20 = vector.broadcast %19 : vector<1x128xf32> to vector<128x128xf32>
    %21 = arith.addf %18, %20 : vector<128x128xf32>
    %c0_17 = arith.constant 0 : index
    %c0_18 = arith.constant 0 : index
    %22 = vector.load %arg8[%c0_17, %c0_18] : memref<128x128xf32, #tpu.memory_space<vmem>>, vector<128x128xf32>
    tpu.vector_store %arg8[%c0_17, %c0_18], %21 {strides = array<i32>} : memref<128x128xf32, #tpu.memory_space<vmem>>, vector<128x128xf32>,
    return
  }
  func.func @transform_0(%arg0: i32) -> (i32, i32) {
    %c0_i32 = arith.constant 0 : i32
    %c0_i32_0 = arith.constant 0 : i32
    return %arg0, %c0_i32 : i32, i32
  }
  func.func @transform_1(%arg0: i32) -> (i32, i32) {
    %c0_i32 = arith.constant 0 : i32
    %c0_i32_0 = arith.constant 0 : i32
    %c0_i32_1 = arith.constant 0 : i32
    return %c0_i32, %c0_i32_0 : i32, i32
  }
  func.func @transform_2(%arg0: i32) -> (i32, i32) {
    %c0_i32 = arith.constant 0 : i32
    %c0_i32_0 = arith.constant 0 : i32
    %c0_i32_1 = arith.constant 0 : i32
    return %c0_i32, %c0_i32_0 : i32, i32
  }
  func.func @transform_3(%arg0: i32) -> (i32, i32) {
    %c0_i32 = arith.constant 0 : i32
    %c0_i32_0 = arith.constant 0 : i32
    %c0_i32_1 = arith.constant 0 : i32
    return %c0_i32, %c0_i32_0 : i32, i32
  }
  func.func @transform_4(%arg0: i32) -> (i32, i32) {
    %c0_i32 = arith.constant 0 : i32
    %c0_i32_0 = arith.constant 0 : i32
    %c0_i32_1 = arith.constant 0 : i32
    return %c0_i32, %c0_i32_0 : i32, i32
  }
  func.func @transform_5(%arg0: i32) -> (i32, i32) {
    %c0_i32 = arith.constant 0 : i32
    %c0_i32_0 = arith.constant 0 : i32
    %c0_i32_1 = arith.constant 0 : i32
    return %c0_i32, %c0_i32_0 : i32, i32
  }
  func.func @transform_6(%arg0: i32) -> (i32, i32) {
    %c0_i32 = arith.constant 0 : i32
    %c0_i32_0 = arith.constant 0 : i32
    %c0_i32_1 = arith.constant 0 : i32
    return %c0_i32, %c0_i32_0 : i32, i32
  }
  func.func @transform_7(%arg0: i32) -> (i32, i32) {
    %c0_i32 = arith.constant 0 : i32
    %c0_i32_0 = arith.constant 0 : i32
    return %arg0, %c0_i32 : i32, i32
  }
}

</mosaic_0001>

<bundles_post_ra>
// kernel: qnetwork_forward.1
= control target key start
LH: loop header
LB: loop body
LE: loop exit
PB: predicated region body
PF: predicated region fallthrough
CT: control target
= control target key end

     0   :  { %s1415_s24 = smov 0   ;;  %s1655_s0 = inlined_call_operand.vmem [shape: bf16[256,128], index: 0, kind: input, shape index: {}]   ;;  %s1656_s1 = inlined_call_operand.vmem [shape: bf16[128,256], index: 1, kind: input, shape index: {}]   ;;  %s1657_s2 = inlined_call_operand.vmem [shape: f32[1,256], index: 2, kind: input, shape index: {}]   ;;  %s1658_s3 = inlined_call_operand.vmem [shape: bf16[256,128], index: 3, kind: input, shape index: {}]   ;;  %s1659_s4 = inlined_call_operand.vmem [shape: f32[1,128], index: 4, kind: input, shape index: {}]   ;;  %s1660_s5 = inlined_call_operand.vmem [shape: bf16[128,128], index: 5, kind: input, shape index: {}]   ;;  %s1661_s6 = inlined_call_operand.vmem [shape: f32[1,128], index: 6, kind: input, shape index: {}]   ;;  %s1662_s7 = inlined_call_operand.vmem [shape: f32[256,128], index: 7, kind: output, shape index: {}]  }
   0x1 LB: > { %s1112_s25 = sadd.s32 4294967295, %s1372_s24   ;;  %p1116_p0 = scmp.ge.s32.totalorder %s1372_s24, 1  ;;  %s1372_s24 = sphi %s1415_s24, %s17_s24  }
   0x2   : > { %p238_p1 = scmp.lt.s32.totalorder %s1372_s24, 3 }
   0x4   : > { %p239_p2 = pnand %p1116_p0, %p238_p1 }
   0x5   : > { %v1310_v0 = vld [vmem:[%s1656_s1 + $0x4] ss:$8 sps:$4 sm:$0xff] (!%p239_p2)   ;;  %s1117_s28 = sshll.u32 (!%p239_p2), %s1112_s25, 4  ;;  %v1312_v1 = vld [vmem:[%s1656_s1] ss:$8 sps:$4 sm:$0xff] (!%p239_p2)   ;;  %v1374_v2 = vmov (!%p239_p2), 0   ;;  %v317_v44 = vlaneseq (!%p239_p2) }
   0x6   : > { %242 = sbr.rel (%p239_p2) target bundleno = 757 (0x2f5), region = 48  ;;  %487 = vmatprep.mubr.bf16.mxu0 (!%p239_p2), %v1374_v2  ;;  %p271_p3 = scmp.lt.s32.totalorder (!%p239_p2), %s1117_s28, 31  ;;  %455 = vmatprep.subr.bf16.mxu0 (!%p239_p2), %v1310_v0  ;;  %v1313_v3 = vld [vmem:[%s1656_s1 + $0x14] ss:$8 sps:$4 sm:$0xff] (!%p239_p2)   ;;  %v1315_v4 = vld [vmem:[%s1656_s1 + $0x10] ss:$8 sps:$4 sm:$0xff] (!%p239_p2)  }
   0x7   : > { %456 = vmatpush1.bf16.msra.mxu0 (!%p239_p2), %v1312_v1  ;;  %v1316_v5 = vld [vmem:[%s1656_s1 + $0x24] ss:$8 sps:$4 sm:$0xff] (!%p239_p2)   ;;  %v1318_v6 = vld [vmem:[%s1656_s1 + $0x20] ss:$8 sps:$4 sm:$0xff] (!%p239_p2)   ;;  %v1319_v7 = vld [vmem:[%s1656_s1 + $0x34] ss:$8 sps:$4 sm:$0xff] (!%p239_p2)  }
   0x8   : > { %457 = vmatprep.subr.bf16.mxu0 (!%p239_p2), %v1313_v3  ;;  %v1321_v8 = vld [vmem:[%s1656_s1 + $0x30] ss:$8 sps:$4 sm:$0xff] (!%p239_p2)   ;;  %v1322_v9 = vld [vmem:[%s1656_s1 + $0x44] ss:$8 sps:$4 sm:$0xff] (!%p239_p2)   ;;  %v1324_v10 = vld [vmem:[%s1656_s1 + $0x40] ss:$8 sps:$4 sm:$0xff] (!%p239_p2)  }
   0x9   : > { %v1325_v11 = vld [vmem:[%s1656_s1 + $0x54] ss:$8 sps:$4 sm:$0xff] (!%p239_p2)   ;;  %v1327_v12 = vld [vmem:[%s1656_s1 + $0x50] ss:$8 sps:$4 sm:$0xff] (!%p239_p2)   ;;  %v1328_v13 = vld [vmem:[%s1656_s1 + $0x64] ss:$8 sps:$4 sm:$0xff] (!%p239_p2)  }
   0xa   : > { %v1342_v14 = vld [vmem:[%s1658_s3 + $0x40] sm:$0xff] (!%p239_p2)   ;;  %v1344_v17 = vld [vmem:[%s1658_s3 + $0x48] sm:$0xff] (!%p239_p2)   ;;  %v1346_v19 = vld [vmem:[%s1658_s3 + $0x50] sm:$0xff] (!%p239_p2)   ;;  %v318_v45 = vshrl.u32 (!%p239_p2), %v317_v44, 7 }
   0xb   : > { %458 = vmatpush1.bf16.msra.mxu0 (!%p239_p2), %v1315_v4  ;;  %v1343_v15 = vld [vmem:[%s1658_s3] sm:$0xff] (!%p239_p2)   ;;  %1173 = vmatprep.subr.bf16.mxu1 (!%p239_p2), %v1342_v14  ;;  %v1345_v18 = vld [vmem:[%s1658_s3 + $0x8] sm:$0xff] (!%p239_p2)   ;;  %v1331_v20 = vld [vmem:[%s1656_s1 + $0x74] ss:$8 sps:$4 sm:$0xff] (!%p239_p2)  }
   0xc   : > { %459 = vmatprep.subr.bf16.mxu0 (!%p239_p2), %v1316_v5  ;;  %v1330_v16 = vld [vmem:[%s1656_s1 + $0x60] ss:$8 sps:$4 sm:$0xff] (!%p239_p2)   ;;  %1174 = vmatpush3.bf16.msra.mxu1 (!%p239_p2), %v1343_v15  ;;  %v1333_v21 = vld [vmem:[%s1656_s1 + $0x70] ss:$8 sps:$4 sm:$0xff] (!%p239_p2)   ;;  %v319_v46 = vsub.s32 (!%p239_p2), 0, %v318_v45  ;;  %v323_v48 = vsub.s32 (!%p239_p2), 1, %v318_v45 }
   0xd   : > { %s1664_s28 = smov (!%p271_p3, %s1117_s28), 31  ;;  %1175 = vmatprep.subr.bf16.mxu1 %v1344_v17  ;;  %v1347_v22 = vld [vmem:[%s1658_s3 + $0x10] sm:$0xff]   ;;  %v1348_v23 = vld [vmem:[%s1658_s3 + $0x58] sm:$0xff]   ;;  %v1350_v26 = vld [vmem:[%s1658_s3 + $0x60] sm:$0xff]  }
   0xe   : > { %s1118_s14 = sshll.u32 %s1664_s28, 2  ;;  %v1349_v25 = vld [vmem:[%s1658_s3 + $0x18] sm:$0xff]   ;;  %v1351_v27 = vld [vmem:[%s1658_s3 + $0x20] sm:$0xff]   ;;  %v1352_v28 = vld [vmem:[%s1658_s3 + $0x68] sm:$0xff]   ;;  %s1120_s9 = sshll.u32 %s1664_s28, 3 }
   0xf   : > { %s1451_s21 = scalar_lea.vmem %s1655_s0, %s1118_s14  ;;  %460 = vmatpush1.bf16.msra.mxu0 %v1318_v6  ;;  %v1353_v36 = vld [vmem:[%s1658_s3 + $0x28] sm:$0xff]   ;;  %v1354_v37 = vld [vmem:[%s1658_s3 + $0x70] sm:$0xff]   ;;  %v1356_v39 = vld [vmem:[%s1658_s3 + $0x78] sm:$0xff]   ;;  %s1634_s14 = scalar_lea.vmem %s1662_s7, %s1120_s9 }
  0x10   : > { %461 = vmatprep.subr.bf16.mxu0 %v1319_v7  ;;  %1176 = vmatpush3.bf16.msra.mxu1 %v1345_v18  ;;  %v1334_v24 = vld [vmem:[%s1451_s21] sm:$0xff]   ;;  %v1335_v29 = vld [vmem:[%s1451_s21 + $0x8] sm:$0xff]   ;;  %v1336_v30 = vld [vmem:[%s1451_s21 + $0x10] sm:$0xff]  }
  0x11   : > { %1177 = vmatprep.subr.bf16.mxu1 %v1346_v19  ;;  %v1337_v31 = vld [vmem:[%s1451_s21 + $0x18] sm:$0xff]   ;;  %v1338_v32 = vld [vmem:[%s1451_s21 + $0x20] sm:$0xff]   ;;  %v1339_v33 = vld [vmem:[%s1451_s21 + $0x28] sm:$0xff]  }
  0x12   : > { %v1340_v34 = vld [vmem:[%s1451_s21 + $0x30] sm:$0xff]   ;;  %v1341_v35 = vld [vmem:[%s1451_s21 + $0x38] sm:$0xff]   ;;  %v1358_v41 = vld [vmem:[%s1660_s5] sm:$0xff]  }
  0x13   : > { %462 = vmatpush1.bf16.msra.mxu0 %v1321_v8  ;;  %v1355_v38 = vld [vmem:[%s1658_s3 + $0x30] sm:$0xff]   ;;  %v1357_v40 = vld [vmem:[%s1658_s3 + $0x38] sm:$0xff]   ;;  %v1359_v42 = vld [vmem:[%s1660_s5 + $0x8] sm:$0xff]  }
  0x14   : > { %463 = vmatprep.subr.bf16.mxu0 %v1322_v9  ;;  %1178 = vmatpush3.bf16.msra.mxu1 %v1347_v22  ;;  %v1360_v43 = vld [vmem:[%s1660_s5 + $0x10] sm:$0xff]   ;;  %v315_v47 = vld [vmem:[%s1657_s2] sm:$0x3] }
  0x15   : > { %1179 = vmatprep.subr.bf16.mxu1 %v1348_v23  ;;  %v1555_v49 = vrot.slane %v315_v47, %v319_v46  ;;  %v1557_v50 = vrot.slane %v315_v47, %v323_v48 }
  0x17   : > { %464 = vmatpush1.bf16.msra.mxu0 %v1324_v10 }
  0x18   : > { %465 = vmatprep.subr.bf16.mxu0 %v1325_v11  ;;  %1180 = vmatpush3.bf16.msra.mxu1 %v1349_v25 }
  0x19   : > { %1181 = vmatprep.subr.bf16.mxu1 %v1350_v26 }
  0x1b   : > { %466 = vmatpush1.bf16.msra.mxu0 %v1327_v12 }
  0x1c   : > { %467 = vmatprep.subr.bf16.mxu0 %v1328_v13  ;;  %1182 = vmatpush3.bf16.msra.mxu1 %v1351_v27 }
  0x1d   : > { %1183 = vmatprep.subr.bf16.mxu1 %v1352_v28 }
  0x1f   : > { %468 = vmatpush1.bf16.msra.mxu0 %v1330_v16 }
  0x20   : > { %469 = vmatprep.subr.bf16.mxu0 %v1331_v20  ;;  %1184 = vmatpush3.bf16.msra.mxu1 %v1353_v36 }
  0x21   : > { %1185 = vmatprep.subr.bf16.mxu1 %v1354_v37 }
  0x23   : > { %470 = vmatpush1.bf16.msra.mxu0 %v1333_v21 }
  0x24   : > { %1186 = vmatpush3.bf16.msra.mxu1 %v1355_v38  ;;  %1253 = vmatprep.subr.bf16.mxu0 %v1358_v41 }
  0x25   : > { %1187 = vmatprep.subr.bf16.mxu1 %v1356_v39 }
  0x26   : > { %488 = vmatmul.mubr.bf16.vlgmr.msra.gmra.mrb[0].mxu0 %v1334_v24 }
  0x27   : > { %497 = vmatprep.mubr.bf16.mxu0 %v1374_v2  ;;  %1254 = vmatpush3.bf16.msra.mxu0 %v1358_v41 }
  0x28   : > { %1188 = vmatpush3.bf16.msra.mxu1 %v1357_v40  ;;  %1255 = vmatprep.subr.bf16.mxu0 %v1359_v42 }
  0x29   : > { %1285 = vmatprep.subr.bf16.mxu1 %v1358_v41 }
  0x2b   : > { %1256 = vmatpush3.bf16.msra.mxu0 %v1359_v42 }
  0x2c   : > { %1257 = vmatprep.subr.bf16.mxu0 %v1360_v43 }
  0x2e   : > { %498 = vmatmul.mubr.bf16.gmra.mrb[4].mxu0 %v1335_v29 }
  0x2f   : > { %507 = vmatprep.mubr.bf16.mxu0 %v1374_v2  ;;  %1258 = vmatpush3.bf16.msra.mxu0 %v1360_v43 }
  0x36   : > { %508 = vmatmul.mubr.bf16.gmra.mrb[8].mxu0 %v1336_v30 }
  0x37   : > { %517 = vmatprep.mubr.bf16.mxu0 %v1374_v2 }
  0x3e   : > { %518 = vmatmul.mubr.bf16.gmra.mrb[12].mxu0 %v1337_v31 }
  0x3f   : > { %527 = vmatprep.mubr.bf16.mxu0 %v1374_v2 }
  0x46   : > { %528 = vmatmul.mubr.bf16.gmra.mrb[16].mxu0 %v1338_v32 }
  0x47   : > { %537 = vmatprep.mubr.bf16.mxu0 %v1374_v2 }
  0x4e   : > { %538 = vmatmul.mubr.bf16.gmra.mrb[20].mxu0 %v1339_v33 }
  0x4f   : > { %547 = vmatprep.mubr.bf16.mxu0 %v1374_v2 }
  0x56   : > { %548 = vmatmul.mubr.bf16.gmra.mrb[24].mxu0 %v1340_v34 }
  0x57   : > { %557 = vmatprep.mubr.bf16.mxu0 %v1374_v2 }
  0x5e   : > { %558 = vmatmul.mubr.bf16.gmra.mrb[28].mxu0 %v1341_v35 }
  0xf9   : > { %v489_v51 = vpop.f32.mrb[0].mxu0 }
  0xfa   : > { %v490_v52 = vadd.f32 %v489_v51, %v1555_v49  ;;  %v491_v53 = vpop.f32.mrb[1].mxu0 }
  0xfb   : > { %v492_v54 = vadd.f32 %v491_v53, %v1557_v50  ;;  %v493_v55 = vpop.f32.mrb[2].mxu0 }
  0xfc   : > { %v494_v56 = vadd.f32 %v493_v55, %v1555_v49  ;;  %v495_v57 = vpop.f32.mrb[3].mxu0  ;;  %v568_v59 = vmax.f32 %v490_v52, 0.0 }
  0xfd   : > { %v496_v58 = vadd.f32 %v495_v57, %v1557_v50  ;;  %v569_v61 = vmax.f32 %v492_v54, 0.0 }
  0xfe   : > { %v570_v60 = vmax.f32 %v494_v56, 0.0 }
  0xff   : > { %v571_v62 = vmax.f32 %v496_v58, 0.0 }
 0x100   : > { %v600_v63 = vpack.c.bf16 %v570_v60, %v568_v59 }
 0x101   : > { %v499_v0 = vpop.f32.mrb[4].mxu0  ;;  %v601_v1 = vpack.c.bf16 %v571_v62, %v569_v61 }
 0x102   : > { %v500_v2 = vadd.f32 %v499_v0, %v1555_v49  ;;  %v501_v3 = vpop.f32.mrb[5].mxu0 }
 0x103   : > { %v502_v4 = vadd.f32 %v501_v3, %v1557_v50  ;;  %v503_v5 = vpop.f32.mrb[6].mxu0  ;;  %783 = vmatprep.mubr.bf16.mxu1 %v601_v1 }
 0x104   : > { %v504_v6 = vadd.f32 %v503_v5, %v1555_v49  ;;  %v505_v7 = vpop.f32.mrb[7].mxu0  ;;  %784 = vmatmul.mubr.bf16.vlgmr.msra.gmra.mrb[0].mxu1 %v600_v63  ;;  %v572_v9 = vmax.f32 %v500_v2, 0.0 }
 0x105   : > { %v506_v8 = vadd.f32 %v505_v7, %v1557_v50  ;;  %1293 = vmatpush3.bf16.msra.mxu1 %v1358_v41  ;;  %v573_v11 = vmax.f32 %v502_v4, 0.0 }
 0x106   : > { %v574_v10 = vmax.f32 %v504_v6, 0.0  ;;  %1286 = vmatprep.subr.bf16.mxu1 %v1359_v42 }
 0x107   : > { %v575_v12 = vmax.f32 %v506_v8, 0.0 }
 0x108   : > { %v602_v13 = vpack.c.bf16 %v574_v10, %v572_v9 }
 0x109   : > { %v603_v14 = vpack.c.bf16 %v575_v12, %v573_v11  ;;  %v509_v15 = vpop.f32.mrb[8].mxu0  ;;  %1294 = vmatpush3.bf16.msra.mxu1 %v1359_v42 }
 0x10a   : > { %v510_v16 = vadd.f32 %v509_v15, %v1555_v49  ;;  %v511_v17 = vpop.f32.mrb[9].mxu0  ;;  %1287 = vmatprep.subr.bf16.mxu1 %v1360_v43 }
 0x10b   : > { %v512_v18 = vadd.f32 %v511_v17, %v1557_v50  ;;  %v513_v19 = vpop.f32.mrb[10].mxu0  ;;  %791 = vmatprep.mubr.bf16.mxu1 %v603_v14 }
 0x10c   : > { %v514_v20 = vadd.f32 %v513_v19, %v1555_v49  ;;  %v515_v21 = vpop.f32.mrb[11].mxu0  ;;  %792 = vmatmul.mubr.bf16.gmra.mrb[4].mxu1 %v602_v13  ;;  %v576_v23 = vmax.f32 %v510_v16, 0.0 }
 0x10d   : > { %v516_v22 = vadd.f32 %v515_v21, %v1557_v50  ;;  %1295 = vmatpush3.bf16.msra.mxu1 %v1360_v43  ;;  %v577_v25 = vmax.f32 %v512_v18, 0.0 }
 0x10e   : > { %v578_v24 = vmax.f32 %v514_v20, 0.0 }
 0x10f   : > { %v579_v26 = vmax.f32 %v516_v22, 0.0 }
 0x110   : > { %v604_v27 = vpack.c.bf16 %v578_v24, %v576_v23 }
 0x111   : > { %v605_v28 = vpack.c.bf16 %v579_v26, %v577_v25  ;;  %v519_v29 = vpop.f32.mrb[12].mxu0 }
 0x112   : > { %v520_v30 = vadd.f32 %v519_v29, %v1555_v49  ;;  %v521_v31 = vpop.f32.mrb[13].mxu0 }
 0x113   : > { %v522_v32 = vadd.f32 %v521_v31, %v1557_v50  ;;  %v523_v33 = vpop.f32.mrb[14].mxu0  ;;  %799 = vmatprep.mubr.bf16.mxu1 %v605_v28 }
 0x114   : > { %v524_v34 = vadd.f32 %v523_v33, %v1555_v49  ;;  %v525_v35 = vpop.f32.mrb[15].mxu0  ;;  %800 = vmatmul.mubr.bf16.gmra.mrb[8].mxu1 %v604_v27  ;;  %v580_v37 = vmax.f32 %v520_v30, 0.0 }
 0x115   : > { %v526_v36 = vadd.f32 %v525_v35, %v1557_v50  ;;  %v581_v39 = vmax.f32 %v522_v32, 0.0 }
 0x116   : > { %v582_v38 = vmax.f32 %v524_v34, 0.0 }
 0x117   : > { %v583_v40 = vmax.f32 %v526_v36, 0.0 }
 0x118   : > { %v606_v41 = vpack.c.bf16 %v582_v38, %v580_v37  ;;  %v1361_v37 = vld [vmem:[%s1660_s5 + $0x18] sm:$0xff]   ;;  %v1364_v38 = vld [vmem:[%s1660_s5 + $0x30] sm:$0xff]  }
 0x119   : > { %v607_v42 = vpack.c.bf16 %v583_v40, %v581_v39  ;;  %v529_v43 = vpop.f32.mrb[16].mxu0  ;;  %1259 = vmatprep.subr.bf16.mxu0 %v1361_v37  ;;  %1288 = vmatprep.subr.bf16.mxu1 %v1361_v37  ;;  %v1365_v39 = vld [vmem:[%s1660_s5 + $0x38] sm:$0xff]  }
 0x11a   : > { %v530_v44 = vadd.f32 %v529_v43, %v1555_v49  ;;  %v531_v45 = vpop.f32.mrb[17].mxu0  ;;  %1260 = vmatpush3.bf16.msra.mxu0 %v1361_v37  ;;  %1296 = vmatpush3.bf16.msra.mxu1 %v1361_v37 }
 0x11b   : > { %v532_v46 = vadd.f32 %v531_v45, %v1557_v50  ;;  %v533_v47 = vpop.f32.mrb[18].mxu0  ;;  %807 = vmatprep.mubr.bf16.mxu1 %v607_v42 }
 0x11c   : > { %v534_v48 = vadd.f32 %v533_v47, %v1555_v49  ;;  %v535_v51 = vpop.f32.mrb[19].mxu0  ;;  %808 = vmatmul.mubr.bf16.gmra.mrb[12].mxu1 %v606_v41  ;;  %v584_v53 = vmax.f32 %v530_v44, 0.0  ;;  %v1609_v41 = vld [vmem:[%s1659_s4] ss:$0 sm:$0xff] }
 0x11d   : > { %v536_v52 = vadd.f32 %v535_v51, %v1557_v50  ;;  %v585_v55 = vmax.f32 %v532_v46, 0.0 }
 0x11e   : > { %v586_v54 = vmax.f32 %v534_v48, 0.0 }
 0x11f   : > { %v587_v56 = vmax.f32 %v536_v52, 0.0 }
 0x120   : > { %v608_v57 = vpack.c.bf16 %v586_v54, %v584_v53 }
 0x121   : > { %v609_v58 = vpack.c.bf16 %v587_v56, %v585_v55  ;;  %v539_v59 = vpop.f32.mrb[20].mxu0 }
 0x122   : > { %v540_v60 = vadd.f32 %v539_v59, %v1555_v49  ;;  %v541_v61 = vpop.f32.mrb[21].mxu0 }
 0x123   : > { %v542_v62 = vadd.f32 %v541_v61, %v1557_v50  ;;  %v543_v63 = vpop.f32.mrb[22].mxu0  ;;  %815 = vmatprep.mubr.bf16.mxu1 %v609_v58 }
 0x124   : > { %v544_v0 = vadd.f32 %v543_v63, %v1555_v49  ;;  %v545_v1 = vpop.f32.mrb[23].mxu0  ;;  %816 = vmatmul.mubr.bf16.gmra.mrb[16].mxu1 %v608_v57  ;;  %v588_v3 = vmax.f32 %v540_v60, 0.0 }
 0x125   : > { %v546_v2 = vadd.f32 %v545_v1, %v1557_v50  ;;  %v589_v5 = vmax.f32 %v542_v62, 0.0 }
 0x126   : > { %v590_v4 = vmax.f32 %v544_v0, 0.0 }
 0x127   : > { %v591_v6 = vmax.f32 %v546_v2, 0.0 }
 0x128   : > { %v610_v7 = vpack.c.bf16 %v590_v4, %v588_v3 }
 0x129   : > { %v611_v8 = vpack.c.bf16 %v591_v6, %v589_v5  ;;  %v549_v9 = vpop.f32.mrb[24].mxu0 }
 0x12a   : > { %v550_v10 = vadd.f32 %v549_v9, %v1555_v49  ;;  %v551_v11 = vpop.f32.mrb[25].mxu0 }
 0x12b   : > { %v552_v12 = vadd.f32 %v551_v11, %v1557_v50  ;;  %v553_v13 = vpop.f32.mrb[26].mxu0  ;;  %823 = vmatprep.mubr.bf16.mxu1 %v611_v8 }
 0x12c   : > { %v554_v14 = vadd.f32 %v553_v13, %v1555_v49  ;;  %v555_v15 = vpop.f32.mrb[27].mxu0  ;;  %824 = vmatmul.mubr.bf16.gmra.mrb[20].mxu1 %v610_v7  ;;  %v592_v17 = vmax.f32 %v550_v10, 0.0 }
 0x12d   : > { %v556_v16 = vadd.f32 %v555_v15, %v1557_v50  ;;  %v593_v19 = vmax.f32 %v552_v12, 0.0 }
 0x12e   : > { %v594_v18 = vmax.f32 %v554_v14, 0.0 }
 0x12f   : > { %v595_v20 = vmax.f32 %v556_v16, 0.0 }
 0x130   : > { %v612_v21 = vpack.c.bf16 %v594_v18, %v592_v17 }
 0x131   : > { %v613_v22 = vpack.c.bf16 %v595_v20, %v593_v19  ;;  %v559_v23 = vpop.f32.mrb[28].mxu0 }
 0x132   : > { %v560_v24 = vadd.f32 %v559_v23, %v1555_v49  ;;  %v561_v25 = vpop.f32.mrb[29].mxu0 }
 0x133   : > { %v562_v26 = vadd.f32 %v561_v25, %v1557_v50  ;;  %v563_v27 = vpop.f32.mrb[30].mxu0  ;;  %831 = vmatprep.mubr.bf16.mxu1 %v613_v22 }
 0x134   : > { %v564_v28 = vadd.f32 %v563_v27, %v1555_v49  ;;  %v565_v29 = vpop.f32.mrb[31].mxu0  ;;  %832 = vmatmul.mubr.bf16.gmra.mrb[24].mxu1 %v612_v21  ;;  %v596_v31 = vmax.f32 %v560_v24, 0.0  ;;  %v1362_v49 = vld [vmem:[%s1660_s5 + $0x20] sm:$0xff]  }
 0x135   : > { %v566_v30 = vadd.f32 %v565_v29, %v1557_v50  ;;  %v597_v33 = vmax.f32 %v562_v26, 0.0  ;;  %1261 = vmatprep.subr.bf16.mxu0 %v1362_v49  ;;  %1289 = vmatprep.subr.bf16.mxu1 %v1362_v49  ;;  %v1363_v50 = vld [vmem:[%s1660_s5 + $0x28] sm:$0xff]  }
 0x136   : > { %v598_v32 = vmax.f32 %v564_v28, 0.0  ;;  %1262 = vmatpush3.bf16.msra.mxu0 %v1362_v49  ;;  %1297 = vmatpush3.bf16.msra.mxu1 %v1362_v49 }
 0x137   : > { %v599_v34 = vmax.f32 %v566_v30, 0.0  ;;  %1263 = vmatprep.subr.bf16.mxu0 %v1363_v50  ;;  %1290 = vmatprep.subr.bf16.mxu1 %v1363_v50 }
 0x138   : > { %v614_v35 = vpack.c.bf16 %v598_v32, %v596_v31 }
 0x139   : > { %v615_v36 = vpack.c.bf16 %v599_v34, %v597_v33 }
 0x13a   : > { %1264 = vmatpush3.bf16.msra.mxu0 %v1363_v50  ;;  %1298 = vmatpush3.bf16.msra.mxu1 %v1363_v50 }
 0x13b   : > { %839 = vmatprep.mubr.bf16.mxu1 %v615_v36  ;;  %1265 = vmatprep.subr.bf16.mxu0 %v1364_v38 }
 0x13c   : > { %840 = vmatmul.mubr.bf16.gmra.mrb[28].mxu1 %v614_v35  ;;  %1291 = vmatprep.subr.bf16.mxu1 %v1364_v38 }
 0x13e   : > { %1266 = vmatpush3.bf16.msra.mxu0 %v1364_v38  ;;  %1299 = vmatpush3.bf16.msra.mxu1 %v1364_v38 }
 0x13f   : > { %1267 = vmatprep.subr.bf16.mxu0 %v1365_v39  ;;  %1292 = vmatprep.subr.bf16.mxu1 %v1365_v39 }
 0x142   : > { %1268 = vmatpush3.bf16.msra.mxu0 %v1365_v39  ;;  %1300 = vmatpush3.bf16.msra.mxu1 %v1365_v39 }
 0x1d7   : > { %v1189_v40 = vpop.f32.mrb[0].mxu1 }
 0x1d8   : > { %v1190_v42 = vpop.f32.mrb[1].mxu1 }
 0x1d9   : > { %v1191_v43 = vadd.f32 %v1190_v42, %v1189_v40  ;;  %v1192_v44 = vpop.f32.mrb[2].mxu1 }
 0x1da   : > { %v1193_v45 = vpop.f32.mrb[3].mxu1 }
 0x1db   : > { %v786_v46 = vadd.f32 %v1191_v43, %v1609_v41  ;;  %v1194_v47 = vadd.f32 %v1193_v45, %v1192_v44 }
 0x1dd   : > { %v789_v48 = vadd.f32 %v1194_v47, %v1609_v41  ;;  %v848_v51 = vmax.f32 %v786_v46, 0.0 }
 0x1df   : > { %v849_v52 = vmax.f32 %v789_v48, 0.0  ;;  %v1195_v53 = vpop.f32.mrb[4].mxu1 }
 0x1e0   : > { %v1196_v54 = vpop.f32.mrb[5].mxu1 }
 0x1e1   : > { %v1197_v55 = vadd.f32 %v1196_v54, %v1195_v53  ;;  %v1198_v56 = vpop.f32.mrb[6].mxu1  ;;  %v864_v57 = vpack.c.bf16 %v849_v52, %v848_v51 }
 0x1e2   : > { %v1199_v58 = vpop.f32.mrb[7].mxu1 }
 0x1e3   : > { %v794_v59 = vadd.f32 %v1197_v55, %v1609_v41  ;;  %v1200_v60 = vadd.f32 %v1199_v58, %v1198_v56  ;;  %1269 = vmatprep.mubr.bf16.mxu0 %v864_v57 }
 0x1e5   : > { %v797_v61 = vadd.f32 %v1200_v60, %v1609_v41  ;;  %v850_v62 = vmax.f32 %v794_v59, 0.0 }
 0x1e7   : > { %v851_v63 = vmax.f32 %v797_v61, 0.0  ;;  %v1201_v0 = vpop.f32.mrb[8].mxu1 }
 0x1e8   : > { %v1202_v1 = vpop.f32.mrb[9].mxu1 }
 0x1e9   : > { %v865_v2 = vpack.c.bf16 %v851_v63, %v850_v62  ;;  %v1203_v3 = vadd.f32 %v1202_v1, %v1201_v0  ;;  %v1204_v4 = vpop.f32.mrb[10].mxu1 }
 0x1ea   : > { %v1205_v5 = vpop.f32.mrb[11].mxu1 }
 0x1eb   : > { %v802_v6 = vadd.f32 %v1203_v3, %v1609_v41  ;;  %v1206_v7 = vadd.f32 %v1205_v5, %v1204_v4  ;;  %1270 = vmatmul.mubr.bf16.vlgmr.msra.gmra.mrb[32].mxu0 %v865_v2  ;;  %v1162_v4 = vld [vmem:[%s1661_s6] ss:$0 sm:$0xff] }
 0x1ed   : > { %v805_v8 = vadd.f32 %v1206_v7, %v1609_v41  ;;  %v852_v9 = vmax.f32 %v802_v6, 0.0 }
 0x1ef   : > { %v853_v10 = vmax.f32 %v805_v8, 0.0  ;;  %v1207_v11 = vpop.f32.mrb[12].mxu1 }
 0x1f0   : > { %v1208_v12 = vpop.f32.mrb[13].mxu1 }
 0x1f1   : > { %v1209_v13 = vadd.f32 %v1208_v12, %v1207_v11  ;;  %v1210_v14 = vpop.f32.mrb[14].mxu1  ;;  %v866_v15 = vpack.c.bf16 %v853_v10, %v852_v9 }
 0x1f2   : > { %v1211_v16 = vpop.f32.mrb[15].mxu1 }
 0x1f3   : > { %v810_v17 = vadd.f32 %v1209_v13, %v1609_v41  ;;  %v1212_v18 = vadd.f32 %v1211_v16, %v1210_v14  ;;  %1273 = vmatprep.mubr.bf16.mxu0 %v866_v15 }
 0x1f5   : > { %v813_v19 = vadd.f32 %v1212_v18, %v1609_v41  ;;  %v854_v20 = vmax.f32 %v810_v17, 0.0 }
 0x1f7   : > { %v855_v21 = vmax.f32 %v813_v19, 0.0  ;;  %v1213_v22 = vpop.f32.mrb[16].mxu1 }
 0x1f8   : > { %v1214_v23 = vpop.f32.mrb[17].mxu1 }
 0x1f9   : > { %v1215_v24 = vadd.f32 %v1214_v23, %v1213_v22  ;;  %v1216_v25 = vpop.f32.mrb[18].mxu1  ;;  %v867_v26 = vpack.c.bf16 %v855_v21, %v854_v20 }
 0x1fa   : > { %v1217_v27 = vpop.f32.mrb[19].mxu1 }
 0x1fb   : > { %v818_v28 = vadd.f32 %v1215_v24, %v1609_v41  ;;  %v1218_v29 = vadd.f32 %v1217_v27, %v1216_v25  ;;  %1274 = vmatmul.mubr.bf16.gmra.mrb[36].mxu0 %v867_v26 }
 0x1fd   : > { %v821_v30 = vadd.f32 %v1218_v29, %v1609_v41  ;;  %v856_v31 = vmax.f32 %v818_v28, 0.0 }
 0x1ff   : > { %v857_v32 = vmax.f32 %v821_v30, 0.0  ;;  %v1219_v33 = vpop.f32.mrb[20].mxu1 }
 0x200   : > { %v1220_v34 = vpop.f32.mrb[21].mxu1 }
 0x201   : > { %v1221_v35 = vadd.f32 %v1220_v34, %v1219_v33  ;;  %v1222_v36 = vpop.f32.mrb[22].mxu1  ;;  %v868_v37 = vpack.c.bf16 %v857_v32, %v856_v31 }
 0x202   : > { %v1223_v49 = vpop.f32.mrb[23].mxu1 }
 0x203   : > { %v826_v50 = vadd.f32 %v1221_v35, %v1609_v41  ;;  %v1224_v38 = vadd.f32 %v1223_v49, %v1222_v36  ;;  %1277 = vmatprep.mubr.bf16.mxu1 %v868_v37 }
 0x205   : > { %v829_v39 = vadd.f32 %v1224_v38, %v1609_v41  ;;  %v858_v40 = vmax.f32 %v826_v50, 0.0 }
 0x207   : > { %v859_v42 = vmax.f32 %v829_v39, 0.0  ;;  %v1225_v43 = vpop.f32.mrb[24].mxu1 }
 0x208   : > { %v1226_v44 = vpop.f32.mrb[25].mxu1 }
 0x209   : > { %v869_v45 = vpack.c.bf16 %v859_v42, %v858_v40  ;;  %v1227_v46 = vadd.f32 %v1226_v44, %v1225_v43  ;;  %v1228_v47 = vpop.f32.mrb[26].mxu1 }
 0x20a   : > { %v1229_v48 = vpop.f32.mrb[27].mxu1 }
 0x20b   : > { %v834_v51 = vadd.f32 %v1227_v46, %v1609_v41  ;;  %v1230_v52 = vadd.f32 %v1229_v48, %v1228_v47  ;;  %1278 = vmatmul.mubr.bf16.vlgmr.msra.gmra.mrb[32].mxu1 %v869_v45 }
 0x20d   : > { %v837_v53 = vadd.f32 %v1230_v52, %v1609_v41  ;;  %v860_v54 = vmax.f32 %v834_v51, 0.0 }
 0x20f   : > { %v861_v55 = vmax.f32 %v837_v53, 0.0  ;;  %v1231_v56 = vpop.f32.mrb[28].mxu1 }
 0x210   : > { %v1232_v57 = vpop.f32.mrb[29].mxu1 }
 0x211   : > { %v1233_v58 = vadd.f32 %v1232_v57, %v1231_v56  ;;  %v1234_v59 = vpop.f32.mrb[30].mxu1  ;;  %v870_v60 = vpack.c.bf16 %v861_v55, %v860_v54 }
 0x212   : > { %v1235_v61 = vpop.f32.mrb[31].mxu1 }
 0x213   : > { %v842_v62 = vadd.f32 %v1233_v58, %v1609_v41  ;;  %v1236_v63 = vadd.f32 %v1235_v61, %v1234_v59  ;;  %1281 = vmatprep.mubr.bf16.mxu1 %v870_v60 }
 0x215   : > { %v845_v0 = vadd.f32 %v1236_v63, %v1609_v41  ;;  %v862_v1 = vmax.f32 %v842_v62, 0.0 }
 0x217   : > { %v863_v2 = vmax.f32 %v845_v0, 0.0 }
 0x219   : > { %v871_v3 = vpack.c.bf16 %v863_v2, %v862_v1 }
 0x21b   : > { %1282 = vmatmul.mubr.bf16.gmra.mrb[36].mxu1 %v871_v3 }
 0x2be   : > { %v1271_v5 = vpop.f32.mrb[32].mxu0 }
 0x2bf   : > { %v986_v41 = vadd.f32 %v1271_v5, %v1162_v4  ;;  %v977_v6 = vpop.f32.mrb[33].mxu0 }
 0x2c0   : > { %v978_v7 = vadd.f32 %v1162_v4, %v977_v6  ;;  %v1272_v8 = vpop.f32.mrb[34].mxu0 }
 0x2c1   : > { %1042 = vst [vmem:[%s1634_s14 + $0x10] sm:$0xff] %v986_v41  ;;  %v989_v9 = vadd.f32 %v1272_v8, %v1162_v4  ;;  %v980_v10 = vpop.f32.mrb[35].mxu0 }
 0x2c2   : > { %1040 = vst [vmem:[%s1634_s14] sm:$0xff] %v978_v7  ;;  %v981_v11 = vadd.f32 %v1162_v4, %v980_v10 }
 0x2c3   : > { %1043 = vst [vmem:[%s1634_s14 + $0x18] sm:$0xff] %v989_v9 }
 0x2c4   : > { %1041 = vst [vmem:[%s1634_s14 + $0x8] sm:$0xff] %v981_v11 }
 0x2ce   : > { %v1275_v12 = vpop.f32.mrb[36].mxu0 }
 0x2cf   : > { %v1002_v13 = vadd.f32 %v1275_v12, %v1162_v4  ;;  %v993_v14 = vpop.f32.mrb[37].mxu0 }
 0x2d0   : > { %v994_v15 = vadd.f32 %v1162_v4, %v993_v14  ;;  %v1276_v16 = vpop.f32.mrb[38].mxu0 }
 0x2d1   : > { %1046 = vst [vmem:[%s1634_s14 + $0x30] sm:$0xff] %v1002_v13  ;;  %v1005_v17 = vadd.f32 %v1276_v16, %v1162_v4  ;;  %v996_v18 = vpop.f32.mrb[39].mxu0 }
 0x2d2   : > { %1044 = vst [vmem:[%s1634_s14 + $0x20] sm:$0xff] %v994_v15  ;;  %v997_v19 = vadd.f32 %v1162_v4, %v996_v18 }
 0x2d3   : > { %1047 = vst [vmem:[%s1634_s14 + $0x38] sm:$0xff] %v1005_v17 }
 0x2d4   : > { %1045 = vst [vmem:[%s1634_s14 + $0x28] sm:$0xff] %v997_v19 }
 0x2de   : > { %v1279_v20 = vpop.f32.mrb[32].mxu1 }
 0x2df   : > { %v1018_v21 = vadd.f32 %v1279_v20, %v1162_v4  ;;  %v1009_v22 = vpop.f32.mrb[33].mxu1 }
 0x2e0   : > { %v1010_v23 = vadd.f32 %v1162_v4, %v1009_v22  ;;  %v1280_v24 = vpop.f32.mrb[34].mxu1 }
 0x2e1   : > { %1050 = vst [vmem:[%s1634_s14 + $0x50] sm:$0xff] %v1018_v21  ;;  %v1021_v25 = vadd.f32 %v1280_v24, %v1162_v4  ;;  %v1012_v26 = vpop.f32.mrb[35].mxu1 }
 0x2e2   : > { %1048 = vst [vmem:[%s1634_s14 + $0x40] sm:$0xff] %v1010_v23  ;;  %v1013_v27 = vadd.f32 %v1162_v4, %v1012_v26 }
 0x2e3   : > { %1051 = vst [vmem:[%s1634_s14 + $0x58] sm:$0xff] %v1021_v25 }
 0x2e4   : > { %1049 = vst [vmem:[%s1634_s14 + $0x48] sm:$0xff] %v1013_v27 }
 0x2ee   : > { %v1283_v28 = vpop.f32.mrb[36].mxu1 }
 0x2ef   : > { %v1034_v29 = vadd.f32 %v1283_v28, %v1162_v4  ;;  %v1025_v30 = vpop.f32.mrb[37].mxu1 }
 0x2f0   : > { %v1026_v31 = vadd.f32 %v1162_v4, %v1025_v30  ;;  %v1284_v32 = vpop.f32.mrb[38].mxu1 }
 0x2f1   : > { %1054 = vst [vmem:[%s1634_s14 + $0x70] sm:$0xff] %v1034_v29  ;;  %v1037_v33 = vadd.f32 %v1284_v32, %v1162_v4  ;;  %v1028_v34 = vpop.f32.mrb[39].mxu1 }
 0x2f2   : > { %1052 = vst [vmem:[%s1634_s14 + $0x60] sm:$0xff] %v1026_v31  ;;  %v1029_v35 = vadd.f32 %v1162_v4, %v1028_v34 }
 0x2f3   : > { %1055 = vst [vmem:[%s1634_s14 + $0x78] sm:$0xff] %v1037_v33 }
 0x2f4   : > { %1053 = vst [vmem:[%s1634_s14 + $0x68] sm:$0xff] %v1029_v35 }
 0x2f5 PF: > { %s17_s24 = sadd.s32 1, %s1372_s24  }
 0x2f6   : > { %p14_p4 = scmp.ge.s32.totalorder %s17_s24, 4  }
 0x2f8   :  { %16 = sbr.rel (!%p14_p4) target bundleno = 1 (0x1), region = 78 }

</bundles_post_ra>
